<compile_context>
chip_gen: v6e
topology: v6e:2x2x1
jax: 0.10.0
libtpu: 0.0.40
codegen_flags: <defaults>
</compile_context>

<pallas_src>
import functools
import math

import jax
import jax.numpy as jnp
from jax.experimental import pallas as pl
from jax.experimental.pallas import tpu as pltpu

# cfg.coarse_loss hyperparameters (3DMatch defaults)
POSITIVE_MARGIN = 0.1
NEGATIVE_MARGIN = 1.4
POSITIVE_OPTIMAL = 0.1
NEGATIVE_OPTIMAL = 1.4
LOG_SCALE = 24.0
POSITIVE_OVERLAP = 0.1

# Static logsumexp shift: circle-loss logits are in [0, LOG_SCALE*(2-0.1)^2 ~ 86.6]
# for normalized features, so exp(logit - 40) stays within f32 range on both ends.
LOGIT_SHIFT = 40.0
_EXP_NEG_SHIFT = math.exp(-LOGIT_SHIFT)   # contribution of a zero-logit (padded) entry
_TINY = 1e-30


def _round_up(x, m):
    return (x + m - 1) // m * m


def _softplus(x):
    # stable softplus; maps -inf -> 0, +inf -> +inf without NaNs
    return jnp.maximum(x, 0.0) + jnp.log(1.0 + jnp.exp(-jnp.abs(x)))


def _vmem_limit_bytes():
    # generation-aware VMEM request: ~half of physical VMEM
    # (128 MiB on v5e/v6e -> 64 MiB, 64 MiB per-TC on v7x -> 32 MiB)
    try:
        info = pltpu.get_tpu_info()
        cap = int(getattr(info, "vmem_capacity_bytes", 128 * 1024 * 1024))
    except Exception:
        cap = 128 * 1024 * 1024
    return int(min(64 * 1024 * 1024, max(32 * 1024 * 1024, cap // 2)))


def _coarse_matching_kernel(ref_ref, srct_ref, sovl_ref, out_ref, *, m_cols, m_pad):
    ref = ref_ref[...]            # (tn, c_pad)    bf16
    srct = srct_ref[...]          # (c_pad, m_pad) bf16
    sovl = sovl_ref[...]          # (tn, m_pad)    bf16 signed sqrt-overlap

    # pairwise_distance(..., normalized=True): sqrt(clamp(2 - 2 * ref @ src^T, 0))
    xy = jnp.dot(ref, srct, preferred_element_type=jnp.float32)
    d = jnp.sqrt(jnp.maximum(2.0 - 2.0 * xy, 0.0))

    # signed sqrt-overlap encoding (decided in f32 in the wrapper):
    #   +sqrt(ovl) if ovl > positive_overlap ; -sqrt(ovl) if 0 < ovl <= thr ; 0 if ovl == 0
    pos_scales = jnp.maximum(sovl, 0).astype(jnp.float32)   # sqrt(ovl) * pos_mask
    pos_f = (sovl > 0).astype(jnp.float32)
    neg_f = (sovl == 0).astype(jnp.float32)

    # circle-loss weights (masks already zero them; masked-out real pairs keep
    # logit 0 -> exp(0) = 1, exactly like the PyTorch WeightedCircleLoss)
    pos_w = jnp.maximum(d - POSITIVE_OPTIMAL, 0.0) * pos_scales
    neg_w = jnp.maximum(NEGATIVE_OPTIMAL - d, 0.0) * neg_f

    # shifted exponentials (one exp pass per matrix, shared by row & column lse).
    # Padded rows/cols land exactly on logit == 0: zero features -> d = sqrt(2)
    # (> neg_optimal) and zero overlap -> zero weights; their exp(-SHIFT)
    # contribution is removed below with static constants.
    ep = jnp.exp(LOG_SCALE * (d - POSITIVE_MARGIN) * pos_w - LOGIT_SHIFT)
    en = jnp.exp(LOG_SCALE * (NEGATIVE_MARGIN - d) * neg_w - LOGIT_SHIFT)

    # ---- row circle loss (the column extent is complete inside this tile) ----
    col_pad = float(m_pad - m_cols)
    col_pad_corr = col_pad * _EXP_NEG_SHIFT
    ep_row = jnp.sum(ep, axis=1, keepdims=True) - col_pad_corr      # (tn, 1)
    en_row = jnp.sum(en, axis=1, keepdims=True) - col_pad_corr
    lse_p = jnp.log(jnp.maximum(ep_row, _TINY)) + LOGIT_SHIFT
    lse_n = jnp.log(jnp.maximum(en_row, _TINY)) + LOGIT_SHIFT
    loss_row = _softplus(lse_p + lse_n) * (1.0 / LOG_SCALE)          # (tn, 1)

    pos_cnt = jnp.sum(pos_f, axis=1, keepdims=True)                  # padded cols add 0
    neg_cnt = jnp.sum(neg_f, axis=1, keepdims=True)                  # padded cols add col_pad
    row_mask_f = jnp.logical_and(pos_cnt > 0.0,
                                 neg_cnt > col_pad).astype(jnp.float32)

    row_sum = jnp.sum(loss_row * row_mask_f, axis=0, keepdims=True)  # (1, 1)
    row_cnt = jnp.sum(row_mask_f, axis=0, keepdims=True)             # (1, 1)

    # ---- column partials (combined + pad-corrected in the JAX epilogue) ----
    csum_pos = jnp.sum(ep, axis=0, keepdims=True)                    # (1, m_pad)
    csum_neg = jnp.sum(en, axis=0, keepdims=True)
    ccnt_pos = jnp.sum(pos_f, axis=0, keepdims=True)
    ccnt_neg = jnp.sum(neg_f, axis=0, keepdims=True)

    # pack everything into one lane-dense (8, m_pad) slab -> single unmasked store
    sub = jax.lax.broadcasted_iota(jnp.int32, (8, m_pad), 0)
    lane = jax.lax.broadcasted_iota(jnp.int32, (8, m_pad), 1)
    packed = (jnp.where(sub == 0, csum_pos, 0.0)
              + jnp.where(sub == 1, csum_neg, 0.0)
              + jnp.where(sub == 2, ccnt_pos, 0.0)
              + jnp.where(sub == 3, ccnt_neg, 0.0)
              + jnp.where(jnp.logical_and(sub == 4, lane == 0), row_sum, 0.0)
              + jnp.where(jnp.logical_and(sub == 4, lane == 1), row_cnt, 0.0))
    out_ref[...] = packed.reshape(1, 8, m_pad)


def coarse_matching_loss(ref_feats, src_feats, gt_node_corr_indices,
                         gt_node_corr_overlaps, *, block_rows=None):
    N, C = ref_feats.shape
    M, C2 = src_feats.shape
    assert C == C2

    if block_rows is None:
        # MXU-friendly row tiles; keep >= 2 tiles once N is non-trivial so the
        # "parallel" grid axis can span both TensorCores on v7x.
        if N <= 128:
            block_rows = _round_up(max(N, 8), 8)
        else:
            n_tiles = max(2, -(-N // 256))
            block_rows = _round_up(-(-N // n_tiles), 8)
    tn = max(8, _round_up(min(block_rows, _round_up(N, 8)), 8))
    n_pad = _round_up(N, tn)
    m_pad = _round_up(M, 128)
    c_pad = _round_up(C, 128)
    grid = n_pad // tn

    # glue: dense *signed sqrt-overlap* matrix (the data-dependent scatter stays
    # in JAX). The sign carries the f32 "overlap > positive_overlap" decision,
    # the magnitude is sqrt(overlap); bf16 halves the dominant HBM/VMEM stream.
    ovl = gt_node_corr_overlaps.astype(jnp.float32)
    signed_sqrt = jnp.where(ovl > POSITIVE_OVERLAP, jnp.sqrt(ovl), -jnp.sqrt(ovl))
    sovl = jnp.zeros((n_pad, m_pad), jnp.bfloat16).at[
        gt_node_corr_indices[:, 0], gt_node_corr_indices[:, 1]
    ].set(signed_sqrt.astype(jnp.bfloat16))

    # bf16 MXU operands, zero padded to lane-dense shapes; src pre-transposed
    ref_p = jnp.zeros((n_pad, c_pad), jnp.bfloat16).at[:N, :C].set(
        ref_feats.astype(jnp.bfloat16))
    srct_p = jnp.zeros((c_pad, m_pad), jnp.bfloat16).at[:C, :M].set(
        src_feats.astype(jnp.bfloat16).T)

    kernel = functools.partial(_coarse_matching_kernel, m_cols=M, m_pad=m_pad)

    packed = pl.pallas_call(
        kernel,
        out_shape=jax.ShapeDtypeStruct((grid, 8, m_pad), jnp.float32),
        grid_spec=pltpu.PrefetchScalarGridSpec(
            num_scalar_prefetch=0,
            grid=(grid,),
            in_specs=[
                pl.BlockSpec((tn, c_pad), lambda i: (i, 0)),
                pl.BlockSpec((c_pad, m_pad), lambda i: (0, 0)),   # constant block
                pl.BlockSpec((tn, m_pad), lambda i: (i, 0)),
            ],
            out_specs=pl.BlockSpec((1, 8, m_pad), lambda i: (i, 0, 0)),
        ),
        compiler_params=pltpu.CompilerParams(
            dimension_semantics=("parallel",),
            vmem_limit_bytes=_vmem_limit_bytes(),
        ),
    )(ref_p, srct_p, sovl)

    # tiny cross-tile epilogue: a few (M,)-sized ops + static padding corrections
    # slab rows: 0 csum_pos, 1 csum_neg, 2 ccnt_pos, 3 ccnt_neg, 4 [row_sum,row_cnt]
    row_sum = jnp.sum(packed[:, 4, 0])
    row_cnt = jnp.sum(packed[:, 4, 1])

    row_pad = float(n_pad - N)
    pad_corr = row_pad * _EXP_NEG_SHIFT
    col_sum_pos = jnp.maximum(jnp.sum(packed[:, 0, :M], axis=0) - pad_corr, _TINY)
    col_sum_neg = jnp.maximum(jnp.sum(packed[:, 1, :M], axis=0) - pad_corr, _TINY)
    col_cnt_pos = jnp.sum(packed[:, 2, :M], axis=0)
    col_cnt_neg = jnp.sum(packed[:, 3, :M], axis=0)     # includes row_pad padded rows

    loss_col = jax.nn.softplus(jnp.log(col_sum_pos) + jnp.log(col_sum_neg)
                               + 2.0 * LOGIT_SHIFT) / LOG_SCALE
    col_mask = jnp.logical_and(col_cnt_pos > 0.0,
                               col_cnt_neg > row_pad).astype(jnp.float32)

    # matches torch: loss_row[row_masks].mean() / loss_col[col_masks].mean()
    # (NaN if a selection is empty, same as .mean() on an empty tensor)
    row_mean = row_sum / row_cnt
    col_mean = jnp.sum(loss_col * col_mask) / jnp.sum(col_mask)
    return 0.5 * (row_mean + col_mean)


def _pure_jax_reference(ref, src, gt_idx, gt_ovl,
                        matmul_dtype=jnp.float32, scale_dtype=jnp.float32):
    # literal translation of CoarseMatchingLoss + WeightedCircleLoss
    N, M = ref.shape[0], src.shape[0]
    overlaps = jnp.zeros((N, M), jnp.float32).at[gt_idx[:, 0], gt_idx[:, 1]].set(
        gt_ovl.astype(jnp.float32))
    a = ref.astype(matmul_dtype).astype(jnp.float32)
    b = src.astype(matmul_dtype).astype(jnp.float32)
    d = jnp.sqrt(jnp.maximum(2.0 - 2.0 * (a @ b.T), 0.0))
    pos = overlaps > POSITIVE_OVERLAP
    neg = overlaps == 0.0
    ps = jnp.sqrt(overlaps * pos.astype(jnp.float32))
    ps = ps.astype(scale_dtype).astype(jnp.float32)
    row_m = (pos.sum(-1) > 0) & (neg.sum(-1) > 0)
    col_m = (pos.sum(0) > 0) & (neg.sum(0) > 0)
    pw = jnp.maximum(0.0, d - 1e5 * (~pos).astype(jnp.float32) - POSITIVE_OPTIMAL) * ps
    nw = jnp.maximum(0.0, NEGATIVE_OPTIMAL - (d + 1e5 * (~neg).astype(jnp.float32)))
    pos_logits = LOG_SCALE * (d - POSITIVE_MARGIN) * pw
    neg_logits = LOG_SCALE * (NEGATIVE_MARGIN - d) * nw
    lr = jax.nn.softplus(jax.nn.logsumexp(pos_logits, -1)
                         + jax.nn.logsumexp(neg_logits, -1)) / LOG_SCALE
    lc = jax.nn.softplus(jax.nn.logsumexp(pos_logits, 0)
                         + jax.nn.logsumexp(neg_logits, 0)) / LOG_SCALE
    return 0.5 * (jnp.sum(lr * row_m) / jnp.sum(row_m)
                  + jnp.sum(lc * col_m) / jnp.sum(col_m))


if __name__ == "__main__":
    key = jax.random.PRNGKey(0)
    N, M, C, K = 56, 48, 32, 16    # ref nodes, src nodes, feat dim, num gt corrs
    k1, k2, k3 = jax.random.split(key, 3)

    ref = jax.random.normal(k1, (N, C), jnp.float32)
    ref = ref / jnp.linalg.norm(ref, axis=-1, keepdims=True)
    src = jax.random.normal(k2, (M, C), jnp.float32)
    src = src / jnp.linalg.norm(src, axis=-1, keepdims=True)

    ref_idx = (jnp.arange(K) * 3) % N
    src_idx = (jnp.arange(K) * 5) % M
    gt_node_corr_indices = jnp.stack([ref_idx, src_idx], axis=1).astype(jnp.int32)
    gt_node_corr_overlaps = jax.random.uniform(k3, (K,), jnp.float32, 0.02, 0.9)

    # block_rows=32 -> 2 row tiles, exercises row + column + channel padding
    loss = coarse_matching_loss(ref, src, gt_node_corr_indices,
                                gt_node_corr_overlaps, block_rows=32)
    jax.block_until_ready(loss)

    # matched-precision (bf16 matmul + bf16 sqrt-overlaps) reference:
    # checks the Pallas implementation itself
    ref_matched = _pure_jax_reference(ref, src, gt_node_corr_indices,
                                      gt_node_corr_overlaps,
                                      matmul_dtype=jnp.bfloat16,
                                      scale_dtype=jnp.bfloat16)
    # full-f32 reference: checks fidelity to the original PyTorch module
    ref_f32 = _pure_jax_reference(ref, src, gt_node_corr_indices,
                                  gt_node_corr_overlaps,
                                  matmul_dtype=jnp.float32,
                                  scale_dtype=jnp.float32)

    assert bool(jnp.isfinite(loss)), loss
    assert jnp.allclose(loss, ref_matched, rtol=5e-3, atol=5e-3), (loss, ref_matched)
    assert jnp.allclose(loss, ref_f32, rtol=3e-2, atol=3e-2), (loss, ref_f32)

    print("KERNEL_OK")
</pallas_src>

<mosaic_0001>
module attributes {stable_mosaic.version = 11 : i64} {
  func.func @_coarse_matching_kernel(%arg0: i32, %arg1: memref<32x128xbf16, #tpu.memory_space<vmem>>, %arg2: memref<128x128xbf16, #tpu.memory_space<vmem>>, %arg3: memref<32x128xbf16, #tpu.memory_space<vmem>>, %arg4: memref<1x8x128xf32, #tpu.memory_space<vmem>>) attributes {dimension_semantics = [#tpu.dimension_semantics<parallel>], iteration_bounds = array<i64: 2>, scalar_prefetch = 0 : i64, scratch_operands = 0 : i64, tpu.core_type = #tpu.core_type<tc>, window_params = [{transform_indices = @transform_0, window_bounds = array<i64: 32, 128>}, {pipeline_mode = #tpu.pipeline_mode<synchronous>, transform_indices = @transform_1, window_bounds = array<i64: 128, 128>}, {transform_indices = @transform_2, window_bounds = array<i64: 32, 128>}, {transform_indices = @transform_3, window_bounds = array<i64: 1, 8, 128>}]} {
    %c0 = arith.constant 0 : index
    %c0_0 = arith.constant 0 : index
    %0 = vector.load %arg1[%c0, %c0_0] : memref<32x128xbf16, #tpu.memory_space<vmem>>, vector<32x128xbf16>
    %c0_1 = arith.constant 0 : index
    %c0_2 = arith.constant 0 : index
    %1 = vector.load %arg2[%c0_1, %c0_2] : memref<128x128xbf16, #tpu.memory_space<vmem>>, vector<128x128xbf16>
    %c0_3 = arith.constant 0 : index
    %c0_4 = arith.constant 0 : index
    %2 = vector.load %arg3[%c0_3, %c0_4] : memref<32x128xbf16, #tpu.memory_space<vmem>>, vector<32x128xbf16>
    %cst = arith.constant dense<0.000000e+00> : vector<32x128xf32>
    %3 = tpu.matmul %0, %1, %cst {dimension_numbers = #tpu.dot_dimension_numbers<[1], [0], [0], [1], [0, 0, 1, 1], [], []>} : vector<32x128xbf16>, vector<128x128xbf16>, vector<32x128xf32> -> vector<32x128xf32>
    %cst_5 = arith.constant 2.000000e+00 : f32
    %4 = vector.broadcast %cst_5 : f32 to vector<32x128xf32>
    %5 = arith.mulf %4, %3 : vector<32x128xf32>
    %cst_6 = arith.constant 2.000000e+00 : f32
    %6 = vector.broadcast %cst_6 : f32 to vector<32x128xf32>
    %7 = arith.subf %6, %5 : vector<32x128xf32>
    %cst_7 = arith.constant 0.000000e+00 : f32
    %8 = vector.broadcast %cst_7 : f32 to vector<32x128xf32>
    %9 = arith.maximumf %7, %8 : vector<32x128xf32>
    %10 = math.sqrt %9 : vector<32x128xf32>
    %cst_8 = arith.constant 0.000000e+00 : bf16
    %11 = vector.broadcast %cst_8 : bf16 to vector<32x128xbf16>
    %12 = arith.maximumf %2, %11 : vector<32x128xbf16>
    %13 = arith.extf %12 : vector<32x128xbf16> to vector<32x128xf32>
    %cst_9 = arith.constant 0.000000e+00 : bf16
    %14 = vector.broadcast %cst_9 : bf16 to vector<32x128xbf16>
    %15 = arith.cmpf ogt, %2, %14 : vector<32x128xbf16>
    %16 = arith.extui %15 : vector<32x128xi1> to vector<32x128xi32>
    %17 = arith.sitofp %16 : vector<32x128xi32> to vector<32x128xf32>
    %cst_10 = arith.constant 0.000000e+00 : bf16
    %18 = vector.broadcast %cst_10 : bf16 to vector<32x128xbf16>
    %19 = arith.cmpf oeq, %2, %18 : vector<32x128xbf16>
    %20 = arith.extui %19 : vector<32x128xi1> to vector<32x128xi32>
    %21 = arith.sitofp %20 : vector<32x128xi32> to vector<32x128xf32>
    %cst_11 = arith.constant 1.000000e-01 : f32
    %22 = vector.broadcast %cst_11 : f32 to vector<32x128xf32>
    %23 = arith.subf %10, %22 : vector<32x128xf32>
    %cst_12 = arith.constant 0.000000e+00 : f32
    %24 = vector.broadcast %cst_12 : f32 to vector<32x128xf32>
    %25 = arith.maximumf %23, %24 : vector<32x128xf32>
    %26 = arith.mulf %25, %13 : vector<32x128xf32>
    %cst_13 = arith.constant 1.400000e+00 : f32
    %27 = vector.broadcast %cst_13 : f32 to vector<32x128xf32>
    %28 = arith.subf %27, %10 : vector<32x128xf32>
    %cst_14 = arith.constant 0.000000e+00 : f32
    %29 = vector.broadcast %cst_14 : f32 to vector<32x128xf32>
    %30 = arith.maximumf %28, %29 : vector<32x128xf32>
    %31 = arith.mulf %30, %21 : vector<32x128xf32>
    %cst_15 = arith.constant 1.000000e-01 : f32
    %32 = vector.broadcast %cst_15 : f32 to vector<32x128xf32>
    %33 = arith.subf %10, %32 : vector<32x128xf32>
    %cst_16 = arith.constant 2.400000e+01 : f32
    %34 = vector.broadcast %cst_16 : f32 to vector<32x128xf32>
    %35 = arith.mulf %34, %33 : vector<32x128xf32>
    %36 = arith.mulf %35, %26 : vector<32x128xf32>
    %cst_17 = arith.constant 4.000000e+01 : f32
    %37 = vector.broadcast %cst_17 : f32 to vector<32x128xf32>
    %38 = arith.subf %36, %37 : vector<32x128xf32>
    %39 = math.exp %38 : vector<32x128xf32>
    %cst_18 = arith.constant 1.400000e+00 : f32
    %40 = vector.broadcast %cst_18 : f32 to vector<32x128xf32>
    %41 = arith.subf %40, %10 : vector<32x128xf32>
    %cst_19 = arith.constant 2.400000e+01 : f32
    %42 = vector.broadcast %cst_19 : f32 to vector<32x128xf32>
    %43 = arith.mulf %42, %41 : vector<32x128xf32>
    %44 = arith.mulf %43, %31 : vector<32x128xf32>
    %cst_20 = arith.constant 4.000000e+01 : f32
    %45 = vector.broadcast %cst_20 : f32 to vector<32x128xf32>
    %46 = arith.subf %44, %45 : vector<32x128xf32>
    %47 = math.exp %46 : vector<32x128xf32>
    %cst_21 = arith.constant dense<0.000000e+00> : vector<32xf32>
    %48 = vector.multi_reduction <add>, %39, %cst_21 [1] : vector<32x128xf32> to vector<32xf32>
    %49 = vector.shape_cast %48 : vector<32xf32> to vector<32x1xf32>
    %cst_22 = arith.constant 3.39868344E-16 : f32
    %50 = vector.broadcast %cst_22 : f32 to vector<32x1xf32>
    %51 = arith.subf %49, %50 : vector<32x1xf32>
    %cst_23 = arith.constant dense<0.000000e+00> : vector<32xf32>
    %52 = vector.multi_reduction <add>, %47, %cst_23 [1] : vector<32x128xf32> to vector<32xf32>
    %53 = vector.shape_cast %52 : vector<32xf32> to vector<32x1xf32>
    %cst_24 = arith.constant 3.39868344E-16 : f32
    %54 = vector.broadcast %cst_24 : f32 to vector<32x1xf32>
    %55 = arith.subf %53, %54 : vector<32x1xf32>
    %cst_25 = arith.constant 1.000000e-30 : f32
    %56 = vector.broadcast %cst_25 : f32 to vector<32x1xf32>
    %57 = arith.maximumf %51, %56 : vector<32x1xf32>
    %58 = math.log %57 : vector<32x1xf32>
    %cst_26 = arith.constant 4.000000e+01 : f32
    %59 = vector.broadcast %cst_26 : f32 to vector<32x1xf32>
    %60 = arith.addf %58, %59 : vector<32x1xf32>
    %cst_27 = arith.constant 1.000000e-30 : f32
    %61 = vector.broadcast %cst_27 : f32 to vector<32x1xf32>
    %62 = arith.maximumf %55, %61 : vector<32x1xf32>
    %63 = math.log %62 : vector<32x1xf32>
    %cst_28 = arith.constant 4.000000e+01 : f32
    %64 = vector.broadcast %cst_28 : f32 to vector<32x1xf32>
    %65 = arith.addf %63, %64 : vector<32x1xf32>
    %66 = arith.addf %60, %65 : vector<32x1xf32>
    %cst_29 = arith.constant 0.000000e+00 : f32
    %67 = vector.broadcast %cst_29 : f32 to vector<32x1xf32>
    %68 = arith.maximumf %66, %67 : vector<32x1xf32>
    %69 = math.absf %66 : vector<32x1xf32>
    %cst_30 = arith.constant 0.000000e+00 : f32
    %70 = vector.broadcast %cst_30 : f32 to vector<32x1xf32>
    %71 = arith.subf %70, %69 : vector<32x1xf32>
    %72 = math.exp %71 : vector<32x1xf32>
    %cst_31 = arith.constant 1.000000e+00 : f32
    %73 = vector.broadcast %cst_31 : f32 to vector<32x1xf32>
    %74 = arith.addf %73, %72 : vector<32x1xf32>
    %75 = math.log %74 : vector<32x1xf32>
    %76 = arith.addf %68, %75 : vector<32x1xf32>
    %cst_32 = arith.constant 0.0416666679 : f32
    %77 = vector.broadcast %cst_32 : f32 to vector<32x1xf32>
    %78 = arith.mulf %76, %77 : vector<32x1xf32>
    %cst_33 = arith.constant dense<0.000000e+00> : vector<32xf32>
    %79 = vector.multi_reduction <add>, %17, %cst_33 [1] : vector<32x128xf32> to vector<32xf32>
    %80 = vector.shape_cast %79 : vector<32xf32> to vector<32x1xf32>
    %cst_34 = arith.constant dense<0.000000e+00> : vector<32xf32>
    %81 = vector.multi_reduction <add>, %21, %cst_34 [1] : vector<32x128xf32> to vector<32xf32>
    %82 = vector.shape_cast %81 : vector<32xf32> to vector<32x1xf32>
    %cst_35 = arith.constant 0.000000e+00 : f32
    %83 = vector.broadcast %cst_35 : f32 to vector<32x1xf32>
    %84 = arith.cmpf ogt, %80, %83 : vector<32x1xf32>
    %cst_36 = arith.constant 8.000000e+01 : f32
    %85 = vector.broadcast %cst_36 : f32 to vector<32x1xf32>
    %86 = arith.cmpf ogt, %82, %85 : vector<32x1xf32>
    %87 = arith.andi %84, %86 : vector<32x1xi1>
    %88 = arith.extui %87 : vector<32x1xi1> to vector<32x1xi32>
    %89 = arith.sitofp %88 : vector<32x1xi32> to vector<32x1xf32>
    %90 = arith.mulf %78, %89 : vector<32x1xf32>
    %cst_37 = arith.constant dense<0.000000e+00> : vector<1xf32>
    %91 = vector.multi_reduction <add>, %90, %cst_37 [0] : vector<32x1xf32> to vector<1xf32>
    %92 = vector.shape_cast %91 : vector<1xf32> to vector<1x1xf32>
    %cst_38 = arith.constant dense<0.000000e+00> : vector<1xf32>
    %93 = vector.multi_reduction <add>, %89, %cst_38 [0] : vector<32x1xf32> to vector<1xf32>
    %94 = vector.shape_cast %93 : vector<1xf32> to vector<1x1xf32>
    %cst_39 = arith.constant dense<0.000000e+00> : vector<128xf32>
    %95 = vector.multi_reduction <add>, %39, %cst_39 [0] : vector<32x128xf32> to vector<128xf32>
    %96 = vector.shape_cast %95 : vector<128xf32> to vector<1x128xf32>
    %cst_40 = arith.constant dense<0.000000e+00> : vector<128xf32>
    %97 = vector.multi_reduction <add>, %47, %cst_40 [0] : vector<32x128xf32> to vector<128xf32>
    %98 = vector.shape_cast %97 : vector<128xf32> to vector<1x128xf32>
    %cst_41 = arith.constant dense<0.000000e+00> : vector<128xf32>
    %99 = vector.multi_reduction <add>, %17, %cst_41 [0] : vector<32x128xf32> to vector<128xf32>
    %100 = vector.shape_cast %99 : vector<128xf32> to vector<1x128xf32>
    %cst_42 = arith.constant dense<0.000000e+00> : vector<128xf32>
    %101 = vector.multi_reduction <add>, %21, %cst_42 [0] : vector<32x128xf32> to vector<128xf32>
    %102 = vector.shape_cast %101 : vector<128xf32> to vector<1x128xf32>
    %103 = tpu.iota {dimensions = array<i32: 0>} : vector<8x128xi32>
    %104 = tpu.iota {dimensions = array<i32: 1>} : vector<8x128xi32>
    %c0_i32 = arith.constant 0 : i32
    %105 = vector.broadcast %c0_i32 : i32 to vector<8x128xi32>
    %106 = arith.cmpi eq, %103, %105 : vector<8x128xi32>
    %cst_43 = arith.constant 0.000000e+00 : f32
    %107 = vector.shape_cast %96 : vector<1x128xf32> to vector<1x128xf32>
    %108 = vector.broadcast %107 : vector<1x128xf32> to vector<8x128xf32>
    %109 = vector.broadcast %cst_43 : f32 to vector<8x128xf32>
    %110 = arith.select %106, %108, %109 : vector<8x128xi1>, vector<8x128xf32>
    %c1_i32 = arith.constant 1 : i32
    %111 = vector.broadcast %c1_i32 : i32 to vector<8x128xi32>
    %112 = arith.cmpi eq, %103, %111 : vector<8x128xi32>
    %cst_44 = arith.constant 0.000000e+00 : f32
    %113 = vector.shape_cast %98 : vector<1x128xf32> to vector<1x128xf32>
    %114 = vector.broadcast %113 : vector<1x128xf32> to vector<8x128xf32>
    %115 = vector.broadcast %cst_44 : f32 to vector<8x128xf32>
    %116 = arith.select %112, %114, %115 : vector<8x128xi1>, vector<8x128xf32>
    %117 = arith.addf %110, %116 : vector<8x128xf32>
    %c2_i32 = arith.constant 2 : i32
    %118 = vector.broadcast %c2_i32 : i32 to vector<8x128xi32>
    %119 = arith.cmpi eq, %103, %118 : vector<8x128xi32>
    %cst_45 = arith.constant 0.000000e+00 : f32
    %120 = vector.shape_cast %100 : vector<1x128xf32> to vector<1x128xf32>
    %121 = vector.broadcast %120 : vector<1x128xf32> to vector<8x128xf32>
    %122 = vector.broadcast %cst_45 : f32 to vector<8x128xf32>
    %123 = arith.select %119, %121, %122 : vector<8x128xi1>, vector<8x128xf32>
    %124 = arith.addf %117, %123 : vector<8x128xf32>
    %c3_i32 = arith.constant 3 : i32
    %125 = vector.broadcast %c3_i32 : i32 to vector<8x128xi32>
    %126 = arith.cmpi eq, %103, %125 : vector<8x128xi32>
    %cst_46 = arith.constant 0.000000e+00 : f32
    %127 = vector.shape_cast %102 : vector<1x128xf32> to vector<1x128xf32>
    %128 = vector.broadcast %127 : vector<1x128xf32> to vector<8x128xf32>
    %129 = vector.broadcast %cst_46 : f32 to vector<8x128xf32>
    %130 = arith.select %126, %128, %129 : vector<8x128xi1>, vector<8x128xf32>
    %131 = arith.addf %124, %130 : vector<8x128xf32>
    %c4_i32 = arith.constant 4 : i32
    %132 = vector.broadcast %c4_i32 : i32 to vector<8x128xi32>
    %133 = arith.cmpi eq, %103, %132 : vector<8x128xi32>
    %c0_i32_47 = arith.constant 0 : i32
    %134 = vector.broadcast %c0_i32_47 : i32 to vector<8x128xi32>
    %135 = arith.cmpi eq, %104, %134 : vector<8x128xi32>
    %136 = arith.andi %133, %135 : vector<8x128xi1>
    %cst_48 = arith.constant 0.000000e+00 : f32
    %137 = vector.shape_cast %92 : vector<1x1xf32> to vector<1x1xf32>
    %138 = vector.broadcast %137 : vector<1x1xf32> to vector<8x128xf32>
    %139 = vector.broadcast %cst_48 : f32 to vector<8x128xf32>
    %140 = arith.select %136, %138, %139 : vector<8x128xi1>, vector<8x128xf32>
    %141 = arith.addf %131, %140 : vector<8x128xf32>
    %c4_i32_49 = arith.constant 4 : i32
    %142 = vector.broadcast %c4_i32_49 : i32 to vector<8x128xi32>
    %143 = arith.cmpi eq, %103, %142 : vector<8x128xi32>
    %c1_i32_50 = arith.constant 1 : i32
    %144 = vector.broadcast %c1_i32_50 : i32 to vector<8x128xi32>
    %145 = arith.cmpi eq, %104, %144 : vector<8x128xi32>
    %146 = arith.andi %143, %145 : vector<8x128xi1>
    %cst_51 = arith.constant 0.000000e+00 : f32
    %147 = vector.shape_cast %94 : vector<1x1xf32> to vector<1x1xf32>
    %148 = vector.broadcast %147 : vector<1x1xf32> to vector<8x128xf32>
    %149 = vector.broadcast %cst_51 : f32 to vector<8x128xf32>
    %150 = arith.select %146, %148, %149 : vector<8x128xi1>, vector<8x128xf32>
    %151 = arith.addf %141, %150 : vector<8x128xf32>
    %152 = vector.shape_cast %151 : vector<8x128xf32> to vector<1x8x128xf32>
    %c0_52 = arith.constant 0 : index
    %c0_53 = arith.constant 0 : index
    %c0_54 = arith.constant 0 : index
    %153 = vector.load %arg4[%c0_52, %c0_53, %c0_54] : memref<1x8x128xf32, #tpu.memory_space<vmem>>, vector<1x8x128xf32>
    tpu.vector_store %arg4[%c0_52, %c0_53, %c0_54], %152 {strides = array<i32>} : memref<1x8x128xf32, #tpu.memory_space<vmem>>, vector<1x8x128xf32>,
    return
  }
  func.func @transform_0(%arg0: i32) -> (i32, i32) {
    %c0_i32 = arith.constant 0 : i32
    %c0_i32_0 = arith.constant 0 : i32
    return %arg0, %c0_i32 : i32, i32
  }
  func.func @transform_1(%arg0: i32) -> (i32, i32) {
    %c0_i32 = arith.constant 0 : i32
    %c0_i32_0 = arith.constant 0 : i32
    %c0_i32_1 = arith.constant 0 : i32
    return %c0_i32, %c0_i32_0 : i32, i32
  }
  func.func @transform_2(%arg0: i32) -> (i32, i32) {
    %c0_i32 = arith.constant 0 : i32
    %c0_i32_0 = arith.constant 0 : i32
    return %arg0, %c0_i32 : i32, i32
  }
  func.func @transform_3(%arg0: i32) -> (i32, i32, i32) {
    %c0_i32 = arith.constant 0 : i32
    %c0_i32_0 = arith.constant 0 : i32
    %c0_i32_1 = arith.constant 0 : i32
    return %arg0, %c0_i32, %c0_i32_0 : i32, i32, i32
  }
}

</mosaic_0001>

<bundles_post_ra>
// kernel: tpu_custom_call.1
= control target key start
LH: loop header
LB: loop body
LE: loop exit
PB: predicated region body
PF: predicated region fallthrough
CT: control target
= control target key end

     0   :  { %8 = vsyncpa [#allocation3], 0  ;;  %s1663_s0 = inlined_call_operand.hbm [shape: bf16[64,128], index: 0, kind: input, shape index: {}]   ;;  %s1664_s1 = inlined_call_operand.hbm [shape: bf16[128,128], index: 1, kind: input, shape index: {}]   ;;  %s1665_s2 = inlined_call_operand.hbm [shape: bf16[64,128], index: 2, kind: input, shape index: {}]   ;;  %s1666_s3 = inlined_call_operand.hbm [shape: f32[2,8,128], index: 3, kind: output, shape index: {}]  }
   0x1   :  { %10 = vsyncpa [#allocation3 + $0x1], 0 }
   0x2   :  { %11 = vsyncpa [#allocation6], 0 }
   0x3   :  { %12 = vsyncpa [#allocation4], 0 }
   0x4   :  { %14 = vsyncpa [#allocation4 + $0x1], 0  ;;  %s1281_s12 = smov 0   ;;  %s1283_s13 = smov 0  }
   0x5   :  { %s1285_s14 = smov 0   ;;  %s1287_s15 = smov 0  }
   0x6 LB: > { %s1302_s16 = sadd.s32 1, %s1251_s15   ;;  %s27_s17 = sadd.s32 1, %s1247_s14  ;;  %s1251_s15 = sphi %s1287_s15, %s1686_s15   ;;  %s1247_s14 = sphi %s1285_s14, %s1685_s14   ;;  %s1243_s13 = sphi %s1283_s13, %s1684_s13   ;;  %s1239_s12 = sphi %s1281_s12, %s1683_s12  }
   0x7   : > { %s24_s18 = ssub.s32 %s1251_s15, %s1302_s16  ;;  %p34_p0 = scmp.ne.s32.totalorder %s1247_s14, %s1243_s13 }
   0x8   : > { %p25_p1 = scmp.eq.s32.totalorder %s24_s18, 0  ;;  %p35_p2 = scmp.eq.s32.totalorder %s1251_s15, 0 }
   0x9   : > { %p991_p5 = scmp.lt.s32.totalorder %s1251_s15, 2  ;;  %s150_s20 = sand.u32 1, %s1251_s15  }
   0xa   : > { %s1311_s19 = scalar_select %p25_p1, %s1247_s14, %s27_s17  }
   0xb   : > { %p36_p3 = por %p35_p2, %p34_p0  ;;  %s152_s21 = sand.u32 1, %s1247_s14  }
   0xc   : > { %s1320_s22 = sshll.u32 %s152_s21, 4  ;;  %s933_s23 = sshll.u32 %s1251_s15, 8 }
   0xd   : > { %s1328_s26 = scalar_lea.hbm %s1663_s0, %s933_s23  ;;  %s154_s27 = scalar_lea.vmem [#allocation2], %s1320_s22 }
   0xe   : > { %s161_s28 = sshll.u32 %s154_s27, 4  ;;  %p1331_p6 = pnand %p991_p5, %p36_p3  ;;  %s1335_s28 = int_to_ptr.vmem [resolvable:$true] %s161_s28 }
   0xf   : > { %s1337_s30 = scalar_lea.sflag [#allocation3], %s150_s20  ;;  %s1097_s4 = scalar_lea.hbm %s1328_s26, 256 }
  0x10   : > { %p1098_p7 = scmp.ne.s32.totalorder %s1328_s26, %s1097_s4  ;;  %p1099_p8 = pneg %p1331_p6 }
  0x11   : > { %s1102_s7 = scalar_lea.hbm %s1663_s0, 512  ;;  %p1103_p11 = scmp.lt.s32.totalorder %s1328_s26, %s1663_s0 }
  0x12   : > { %p1100_p9 = pnand %p1099_p8, %p1098_p7  ;;  %p1104_p12 = scmp.lt.s32.totalorder %s1102_s7, %s1097_s4 }
  0x14   : > { %p1101_p10 = pneg %p1100_p9  ;;  %p1105_p13 = por %p1104_p12, %p1103_p11 }
  0x16   : > { %p1106_p1 = pnand %p1105_p13, %p1101_p10 }
  0x18   : > { %1109 = shalt.err (!%p1106_p1)
}
  0x19   : > { %s1110_s10 = scalar_lea.vmem %s1335_s28, 256  ;;  %s1253_s11 = smov [#allocation2]  }
  0x1a   : > { %p1111_p2 = scmp.ne.s32.totalorder %s1335_s28, %s1110_s10  ;;  %s1115_s17 = sshll.u32 %s1253_s11, 4  ;;  %s1116_s17 = int_to_ptr.vmem [resolvable:$false] %s1115_s17 }
  0x1b   : > { %s1117_s18 = scalar_lea.vmem %s1116_s17, 512  ;;  %p1118_p7 = scmp.lt.s32.totalorder %s1335_s28, %s1116_s17 }
  0x1c   : > { %p1113_p3 = pnand %p1111_p2, %p1099_p8  ;;  %p1119_p9 = scmp.lt.s32.totalorder %s1117_s18, %s1110_s10 }
  0x1e   : > { %p1114_p5 = pneg %p1113_p3  ;;  %p1120_p4 = por %p1119_p9, %p1118_p7 }
  0x20   : > { %p1121_p11 = pnand %p1120_p4, %p1114_p5 }
  0x22   : > { %1124 = shalt.err (!%p1121_p11)
}
  0x23   : > { %s1254_s20 = smov 64   ;;  %s1255_s21 = smov 4  }
  0x24   : > { %982 = dma.hbm_to_vmem [thread:$0]  (!%p1331_p6), %s1328_s26, 256, %s1335_s28, %s1337_s30, %s1254_s20, %s1254_s20, %s1255_s21  }
  0x25   : > { %s175_s24 = scalar_lea.vmem [#allocation7], %s1320_s22  ;;  %s1369_s27 = sadd.s32 4294967295, %s1251_s15  }
  0x26   : > { %s182_s25 = sshll.u32 %s175_s24, 4  ;;  %s872_s4 = sadd.s32 4294967294, %s1251_s15   ;;  %s1402_s25 = int_to_ptr.vmem [resolvable:$true] %s182_s25 }
  0x27   : > { %p40_p4 = scmp.ne.s32.totalorder %s1243_s13, %s1239_s12  ;;  %p1667_p10 = scmp.eq.s32.totalorder %s1369_s27, 0 }
  0x28   : > { %p111_p12 = scmp.eq.s32.totalorder %s1369_s27, 1  ;;  %p117_p13 = scmp.eq.s32.totalorder %s872_s4, 1 }
  0x29   : > { %p1378_p1 = por %p1667_p10, %p40_p4  ;;  %p873_p2 = scmp.ge.s32.totalorder %s1251_s15, 1 }
  0x2a   : > { %p1386_p3 = por %p111_p12, %p34_p0  ;;  %p1390_p5 = por %p117_p13, %p40_p4 }
  0x2b   : > { %s1671_s5 = scalar_select %p1378_p1, 1, 0 }
  0x2c   : > { %s1672_s22 = scalar_select %p1386_p3, 1, 0 }
  0x2d   : > { %s1673_s26 = scalar_select %p1390_p5, 1, 0 }
  0x2e   : > { %p124_p7 = scmp.lt.s32.totalorder %s1251_s15, 3  ;;  %s1400_s7 = scalar_lea.hbm %s1665_s2, %s933_s23 }
  0x2f   : > { %s1256_s9 = smov [#allocation5]   ;;  %s1125_s11 = scalar_lea.hbm %s1400_s7, 256 }
  0x30   : > { %p1404_p0 = pnand %p873_p2, %p124_p7  ;;  %s1408_s10 = sshll.u32 %s1256_s9, 4  ;;  %s137_s10 = int_to_ptr.vmem [resolvable:$true] %s1408_s10 }
  0x31   : > { %p1126_p11 = scmp.ne.s32.totalorder %s1400_s7, %s1125_s11  ;;  %s1130_s18 = scalar_lea.hbm %s1665_s2, 512 }
  0x32   : > { %p1131_p13 = scmp.lt.s32.totalorder %s1400_s7, %s1665_s2  ;;  %p1132_p2 = scmp.lt.s32.totalorder %s1130_s18, %s1125_s11 }
  0x33   : > { %p1128_p4 = pnand %p1126_p11, %p1099_p8 }
  0x34   : > { %p1133_p7 = por %p1132_p2, %p1131_p13 }
  0x35   : > { %p1129_p12 = pneg %p1128_p4 }
  0x37   : > { %p1134_p10 = pnand %p1133_p7, %p1129_p12 }
  0x39   : > { %1137 = shalt.err (!%p1134_p10)
}
  0x3a   : > { %s1138_s28 = scalar_lea.vmem %s1402_s25, 256  ;;  %s1257_s6 = smov [#allocation7]  }
  0x3b   : > { %p1139_p9 = scmp.ne.s32.totalorder %s1402_s25, %s1138_s28  ;;  %s1143_s9 = sshll.u32 %s1257_s6, 4  ;;  %s1144_s9 = int_to_ptr.vmem [resolvable:$false] %s1143_s9 }
  0x3c   : > { %s1145_s23 = scalar_lea.vmem %s1144_s9, 512  ;;  %p1146_p5 = scmp.lt.s32.totalorder %s1402_s25, %s1144_s9 }
  0x3d   : > { %p1141_p11 = pnand %p1139_p9, %p1099_p8  ;;  %p1147_p3 = scmp.lt.s32.totalorder %s1145_s23, %s1138_s28 }
  0x3f   : > { %p1142_p4 = pneg %p1141_p11  ;;  %p1148_p1 = por %p1147_p3, %p1146_p5 }
  0x41   : > { %p1149_p13 = pnand %p1148_p1, %p1142_p4 }
  0x43   : > { %1152 = shalt.err (!%p1149_p13)
}
  0x44   : > { %985 = dma.hbm_to_vmem [thread:$0]  (!%p1331_p6), %s1400_s7, 256, %s1402_s25, %s1337_s30, %s1254_s20, %s1254_s20, %s1255_s21  }
  0x45   : > { %p1675_p8 = scmp.eq.s32.totalorder %s1369_s27, 0  ;;  %p1676_p10 = pneg %p1404_p0 }
  0x46   : > { %s1164_s11 = scalar_lea.vmem %s137_s10, 1024  ;;  %p1172_p2 = scmp.lt.s32.totalorder %s137_s10, %s137_s10 }
  0x47   : > { %p976_p9 = pnand %p1676_p10, %p1675_p8  ;;  %p1165_p1 = scmp.ne.s32.totalorder %s137_s10, %s1164_s11 }
  0x48   : > { %p1173_p7 = scmp.lt.s32.totalorder %s1164_s11, %s1164_s11 }
  0x49   : > { %p1155_p3 = pneg %p976_p9 }
  0x4a   : > { %p1174_p11 = por %p1173_p7, %p1172_p2 }
  0x4b   : > { %p1167_p5 = pnand %p1165_p1, %p1155_p3 }
  0x4d   : > { %p1168_p12 = pneg %p1167_p5 }
  0x4f   : > { %p1175_p4 = pnand %p1174_p11, %p1168_p12 }
  0x51   : > { %1178 = shalt.err (!%p1175_p4)
}
  0x52   : > { %978 = dma.hbm_to_vmem [thread:$0]  (!%p976_p9), %s1664_s1, 1024, %s137_s10, [#allocation6], %s1254_s20, %s1254_s20, %s1255_s21  }
  0x53   : > { %194 = sbr.rel (%p1404_p0) target bundleno = 622 (0x26e), region = 32  ;;  %s196_s25 = sand.u32 (!%p1404_p0), 1, %s1369_s27  }
  0x54   : > { %s1454_s7 = sand.u32 (!%p1404_p0), 1, %s1243_s13   ;;  %s197_s18 = scalar_lea.sflag (!%p1404_p0), [#allocation3], %s196_s25 }
  0x55   : > { %s883_s17 = sshll.u32 (!%p1404_p0), %s1454_s7, 4  ;;  %p1677_p6 = scmp.ne.s32.totalorder (!%p1404_p0), %s1671_s5, 0 }
  0x56   : > { %s1457_s24 = scalar_lea.vmem (!%p1404_p0), [#allocation2], %s883_s17 }
  0x58   : > { %1222 = dma.done.wait (%p1677_p6), %s197_s18, 256  }
  0x59   : > { %1224 = vsyncadd (%p1677_p6), %s197_s18, 4294967040  ;;  %p1678_p13 = scmp.eq.s32.totalorder %s1369_s27, 0 }
  0x5b   : > { %1226 = dma.done.wait (%p1678_p13), [#allocation6], 1024   ;;  %p1679_p0 = pmov %p1678_p13 }
  0x5c   : > { %s1467_s20 = scalar_lea.vmem [#allocation7], %s883_s17 }
  0x5d   : > { %1228 = vsyncadd (%p1679_p0), [#allocation6], 4294966272 }
  0x5e   : > { %1230 = dma.done.wait (%p1677_p6), %s197_s18, 256  }
  0x5f   : > { %1232 = vsyncadd (%p1677_p6), %s197_s18, 4294967040  ;;  %v1031_v0 = vld [vmem:[#allocation5 + $0x38] sm:$0xff]   ;;  %v1032_v1 = vld [vmem:[#allocation5 + $0x30] sm:$0xff]   ;;  %v1258_v27 = vmov 0   ;;  %v1259_v45 = vmov 0.0   ;;  %s886_s21 = sshll.u32 %s1454_s7, 3 }
  0x60   : > { %945 = vmatprep.subr.bf16.mxu0 %v1031_v0  ;;  %v1033_v2 = vld [vmem:[#allocation5 + $0x28] sm:$0xff]   ;;  %v1034_v3 = vld [vmem:[#allocation5 + $0x20] sm:$0xff]   ;;  %v1035_v5 = vld [vmem:[#allocation5 + $0x18] sm:$0xff]   ;;  %s930_s5 = sshll.u32 %s1369_s27, 7  ;;  %s240_s8 = scalar_lea.vmem [#allocation8], %s886_s21 }
  0x61   : > { %946 = vmatpush3.bf16.msra.mxu0 %v1031_v0  ;;  %v1039_v4 = vld [vmem:[%s1457_s24] sm:$0xff]   ;;  %v1037_v7 = vld [vmem:[#allocation5 + $0x8] sm:$0xff]   ;;  %s772_s10 = sshll.u32 %s240_s8, 4  ;;  %s770_s6 = scalar_lea.hbm %s1666_s3, %s930_s5  ;;  %s773_s10 = int_to_ptr.vmem [resolvable:$true] %s772_s10 }
  0x62   : > { %947 = vmatprep.subr.bf16.mxu0 %v1032_v1  ;;  %961 = vmatprep.mubr.bf16.mxu0 %v1039_v4  ;;  %v1036_v6 = vld [vmem:[#allocation5 + $0x10] sm:$0xff]   ;;  %v1038_v8 = vld [vmem:[#allocation5] sm:$0xff]   ;;  %v1040_v9 = vld [vmem:[%s1457_s24 + $0x8] sm:$0xff]   ;;  %s759_s9 = scalar_lea.sflag [#allocation4], %s1454_s7  ;;  %s1179_s23 = scalar_lea.vmem %s773_s10, 128 }
  0x63   : > { %v1476_v16 = vld [vmem:[%s1467_s20 + $0x8] sm:$0xf]  ;;  %v1479_v20 = vld [vmem:[%s1467_s20] sm:$0xf]  ;;  %v1483_v22 = vld [vmem:[%s1467_s20 + $0xc] sm:$0xf]  ;;  %p1180_p8 = scmp.ne.s32.totalorder %s773_s10, %s1179_s23 }
  0x64   : > { %vm453_vm0 = vcmp.eq.bf16.partialorder %v1476_v16, 0  ;;  %vm451_vm1 = vcmp.eq.bf16.partialorder %v1479_v20, 0  ;;  %v1489_v26 = vld [vmem:[%s1467_s20 + $0x4] sm:$0xf]  ;;  %vm454_vm2 = vcmp.eq.bf16.partialorder %v1483_v22, 0  ;;  %v421_v37 = vmax.bf16 %v1258_v27, %v1476_v16  ;;  %p1680_p10 = scmp.ne.s32.totalorder %s1672_s22, 0 }
  0x65   : > { %948 = vmatpush3.bf16.msra.mxu0 %v1032_v1  ;;  %v457_v28 = vsel %vm453_vm0, 65537, %v1258_v27  ;;  %v455_v31 = vsel %vm451_vm1, 65537, %v1258_v27  ;;  %vm452_vm3 = vcmp.eq.bf16.partialorder %v1489_v26, 0  ;;  %v458_v32 = vsel %vm454_vm2, 65537, %v1258_v27  ;;  %s1260_s11 = smov [#allocation8]  }
  0x66   : > { %949 = vmatprep.subr.bf16.mxu0 %v1033_v2  ;;  %v461_v34 = vunpack.c.l.b16 %v457_v28  ;;  %v459_v35 = vunpack.c.l.b16 %v455_v31  ;;  %v456_v36 = vsel %vm452_vm3, 65537, %v1258_v27  ;;  %v462_v38 = vunpack.c.l.b16 %v458_v32  ;;  %p1181_p9 = pnand %p1180_p8, %p1680_p10  ;;  %s1183_s29 = sshll.u32 %s1260_s11, 4  ;;  %s1184_s29 = int_to_ptr.vmem [resolvable:$false] %s1183_s29 }
  0x67   : > { %v460_v39 = vunpack.c.l.b16 %v456_v36  ;;  %v419_v40 = vmax.bf16 %v1258_v27, %v1479_v20  ;;  %v1510_v41 = vmax.bf16 %v1258_v27, %v1489_v26  ;;  %v425_v43 = vunpack.c.l.bf16 %v421_v37  ;;  %s1185_s27 = scalar_lea.vmem %s1184_s29, 256  ;;  %p1186_p1 = scmp.lt.s32.totalorder %s773_s10, %s1184_s29 }
  0x68   : > { %vm465_vm4 = vcmp.ne.s32.totalorder %v461_v34, 0  ;;  %vm463_vm5 = vcmp.ne.s32.totalorder %v459_v35, 0  ;;  %vm466_vm6 = vcmp.ne.s32.totalorder %v462_v38, 0  ;;  %v1520_v50 = vmax.bf16 %v1258_v27, %v1483_v22  ;;  %p1182_p3 = pneg %p1181_p9  ;;  %p1187_p5 = scmp.lt.s32.totalorder %s1185_s27, %s1179_s23 }
  0x69   : > { %950 = vmatpush3.bf16.msra.mxu0 %v1033_v2  ;;  %v1513_v46 = vsel %vm465_vm4, 1.0, %v1259_v45  ;;  %v1516_v47 = vsel %vm463_vm5, 1.0, %v1259_v45  ;;  %vm464_vm7 = vcmp.ne.s32.totalorder %v460_v39, 0  ;;  %v423_v49 = vunpack.c.l.bf16 %v419_v40 }
  0x6a   : > { %951 = vmatprep.subr.bf16.mxu0 %v1034_v3  ;;  %v424_v53 = vunpack.c.l.bf16 %v1510_v41  ;;  %v1524_v54 = vsel %vm466_vm6, 1.0, %v1259_v45  ;;  %v1529_v57 = vsel %vm464_vm7, 1.0, %v1259_v45  ;;  %vm428_vm0 = vcmp.gt.bf16.partialorder %v1489_v26, 0  ;;  %p1188_p12 = por %p1187_p5, %p1186_p1 }
  0x6b   : > { %vm427_vm1 = vcmp.gt.bf16.partialorder %v1479_v20, 0  ;;  %vm429_vm2 = vcmp.gt.bf16.partialorder %v1476_v16, 0  ;;  %vm430_vm5 = vcmp.gt.bf16.partialorder %v1483_v22, 0 }
  0x6c   : > { %p1189_p2 = pnand %p1188_p12, %p1182_p3 }
  0x6d   : > { %952 = vmatpush3.bf16.msra.mxu0 %v1034_v3 }
  0x6e   : > { %953 = vmatprep.subr.bf16.mxu0 %v1035_v5 }
  0x71   : > { %954 = vmatpush3.bf16.msra.mxu0 %v1035_v5 }
  0x72   : > { %955 = vmatprep.subr.bf16.mxu0 %v1036_v6 }
  0x75   : > { %956 = vmatpush3.bf16.msra.mxu0 %v1036_v6 }
  0x76   : > { %957 = vmatprep.subr.bf16.mxu0 %v1037_v7 }
  0x79   : > { %958 = vmatpush3.bf16.msra.mxu0 %v1037_v7 }
  0x7a   : > { %959 = vmatprep.subr.bf16.mxu0 %v1038_v8 }
  0x7d   : > { %960 = vmatpush3.bf16.msra.mxu0 %v1038_v8 }
  0x80   : > { %962 = vmatmul.mubr.bf16.vlgmr.msra.gmra.mxu0 %v1040_v9 }
 0x140   : > { %v963_v10 = vpop.f32.mrf.mxu0 }
 0x141   : > { %v381_v11 = vmul.f32 2.0, %v963_v10 }
 0x142   : > { %v364_v12 = vpop.f32.mrf.mxu0 }
 0x143   : > { %v385_v13 = vsub.f32 2.0, %v381_v11  ;;  %v379_v14 = vmul.f32 2.0, %v364_v12 }
 0x144   : > { %v964_v15 = vpop.f32.mrf.mxu0 }
 0x145   : > { %v389_v17 = vmax.f32 %v385_v13, 0.0  ;;  %v383_v18 = vsub.f32 2.0, %v379_v14  ;;  %v382_v19 = vmul.f32 2.0, %v964_v15 }
 0x146   : > { %v367_v21 = vpop.f32.mrf.mxu0 }
 0x147   : > { %1041 = vrsqrt.f32 %v389_v17  ;;  %v1485_v23 = vmax.f32 %v383_v18, 0.0  ;;  %v386_v24 = vsub.f32 2.0, %v382_v19  ;;  %v380_v25 = vmul.f32 2.0, %v367_v21 }
 0x148   : > { %vm407_vm8 = vcmp.eq.f32.partialorder %v389_v17, inf  ;;  %v410_v48 = vand.u32 2147483648, %v389_v17  ;;  %vm409_vm9 = vcmp.eq.f32.partialorder %v389_v17, 0.0 }
 0x149   : > { %1043 = vrsqrt.f32 %v1485_v23  ;;  %v1494_v29 = vmax.f32 %v386_v24, 0.0  ;;  %v384_v30 = vsub.f32 2.0, %v380_v25  ;;  %vm393_vm10 = vcmp.eq.f32.partialorder %v1485_v23, inf }
 0x14a   : > { %vm395_vm11 = vcmp.eq.f32.partialorder %v1485_v23, 0.0  ;;  %v396_v58 = vand.u32 2147483648, %v1485_v23 }
 0x14b   : > { %1045 = vrsqrt.f32 %v1494_v29  ;;  %v1500_v33 = vmax.f32 %v384_v30, 0.0  ;;  %vm414_vm12 = vcmp.eq.f32.partialorder %v1494_v29, inf  ;;  %vm416_vm13 = vcmp.eq.f32.partialorder %v1494_v29, 0.0 }
 0x14c   : > { %v417_v63 = vand.u32 2147483648, %v1494_v29 }
 0x14d   : > { %1047 = vrsqrt.f32 %v1500_v33  ;;  %vm400_vm14 = vcmp.eq.f32.partialorder %v1500_v33, inf  ;;  %vm402_vm15 = vcmp.eq.f32.partialorder %v1500_v33, 0.0  ;;  %v403_v12 = vand.u32 2147483648, %v1500_v33 }
 0x154   : > { %v1042_v42 = vpop.eup %1041 }
 0x155   : > { %v406_v44 = vmul.f32 %v1042_v42, %v389_v17 }
 0x156   : > { %v1044_v51 = vpop.eup %1043 }
 0x157   : > { %v408_v52 = vsel %vm407_vm8, %v389_v17, %v406_v44  ;;  %v392_v55 = vmul.f32 %v1044_v51, %v1485_v23 }
 0x158   : > { %v411_v56 = vsel %vm409_vm9, %v410_v48, %v408_v52  ;;  %v1046_v61 = vpop.eup %1045 }
 0x159   : > { %v489_v59 = vsub.f32 1.4, %v411_v56  ;;  %v907_v60 = vadd.f32 -0.1, %v411_v56  ;;  %v394_v62 = vsel %vm393_vm10, %v1485_v23, %v392_v55  ;;  %v413_v0 = vmul.f32 %v1046_v61, %v1494_v29 }
 0x15a   : > { %v397_v5 = vsel %vm395_vm11, %v396_v58, %v394_v62  ;;  %v1048_v6 = vpop.eup %1047 }
 0x15b   : > { %v493_v1 = vmax.f32 %v489_v59, 0.0  ;;  %v481_v2 = vmax.f32 %v907_v60, 0.0  ;;  %v521_v3 = vmul.f32 24.0, %v489_v59  ;;  %v501_v4 = vmul.f32 24.0, %v907_v60 }
 0x15c   : > { %v415_v7 = vsel %vm414_vm12, %v1494_v29, %v413_v0  ;;  %v487_v10 = vsub.f32 1.4, %v397_v5  ;;  %v399_v11 = vmul.f32 %v1048_v6, %v1500_v33  ;;  %v905_v13 = vadd.f32 -0.1, %v397_v5 }
 0x15d   : > { %v497_v8 = vmul.f32 %v1513_v46, %v493_v1  ;;  %v485_v9 = vmul.f32 %v481_v2, %v425_v43  ;;  %v418_v14 = vsel %vm416_vm13, %v417_v63, %v415_v7  ;;  %v426_v60 = vunpack.c.l.bf16 %v1520_v50 }
 0x15e   : > { %v491_v18 = vmax.f32 %v487_v10, 0.0  ;;  %v519_v19 = vmul.f32 24.0, %v487_v10  ;;  %v401_v21 = vsel %vm400_vm14, %v1500_v33, %v399_v11  ;;  %v479_v23 = vmax.f32 %v905_v13, 0.0 }
 0x15f   : > { %v525_v15 = vmul.f32 %v521_v3, %v497_v8  ;;  %v505_v17 = vmul.f32 %v501_v4, %v485_v9  ;;  %v499_v24 = vmul.f32 24.0, %v905_v13  ;;  %v490_v25 = vsub.f32 1.4, %v418_v14 }
 0x160   : > { %v495_v31 = vmul.f32 %v1516_v47, %v491_v18  ;;  %v404_v32 = vsel %vm402_vm15, %v403_v12, %v401_v21  ;;  %v483_v29 = vmul.f32 %v479_v23, %v423_v49  ;;  %v908_v61 = vadd.f32 -0.1, %v418_v14 }
 0x161   : > { %v915_v28 = vadd.f32 -40.0, %v525_v15  ;;  %v911_v30 = vadd.f32 -40.0, %v505_v17  ;;  %v488_v34 = vsub.f32 1.4, %v404_v32  ;;  %v906_v35 = vadd.f32 -0.1, %v404_v32 }
 0x162   : > { %v494_v36 = vmax.f32 %v490_v25, 0.0  ;;  %v523_v39 = vmul.f32 %v519_v19, %v495_v31  ;;  %v522_v40 = vmul.f32 24.0, %v490_v25  ;;  %v503_v42 = vmul.f32 %v499_v24, %v483_v29 }
 0x163   : > { %v535_v37 = vmul.f32 1.442695, %v915_v28  ;;  %v515_v38 = vmul.f32 1.442695, %v911_v30  ;;  %v492_v43 = vmax.f32 %v488_v34, 0.0  ;;  %v520_v44 = vmul.f32 24.0, %v488_v34 }
 0x164   : > { %v480_v48 = vmax.f32 %v906_v35, 0.0  ;;  %v913_v51 = vadd.f32 -40.0, %v523_v39  ;;  %v500_v52 = vmul.f32 24.0, %v906_v35  ;;  %v498_v55 = vmul.f32 %v1524_v54, %v494_v36 }
 0x165   : > { %1049 = vpow2.f32 %v535_v37  ;;  %v909_v33 = vadd.f32 -40.0, %v503_v42  ;;  %v496_v49 = vmul.f32 %v1529_v57, %v492_v43  ;;  %v482_v1 = vmax.f32 %v908_v61, 0.0 }
 0x166   : > { %1051 = vpow2.f32 %v515_v38  ;;  %v484_v56 = vmul.f32 %v480_v48, %v424_v53  ;;  %v531_v58 = vmul.f32 1.442695, %v913_v51  ;;  %v526_v59 = vmul.f32 %v522_v40, %v498_v55 }
 0x167   : > { %v511_v62 = vmul.f32 1.442695, %v909_v33  ;;  %v524_v63 = vmul.f32 %v520_v44, %v496_v49  ;;  %v486_v5 = vmul.f32 %v482_v1, %v426_v60  ;;  %v502_v6 = vmul.f32 24.0, %v908_v61 }
 0x168   : > { %v504_v0 = vmul.f32 %v500_v52, %v484_v56  ;;  %1053 = vpow2.f32 %v531_v58  ;;  %v916_v4 = vadd.f32 -40.0, %v526_v59  ;;  %v432_v14 = vsel %vm428_vm0, 65537, %v1258_v27 }
 0x169   : > { %1055 = vpow2.f32 %v511_v62  ;;  %v914_v2 = vadd.f32 -40.0, %v524_v63  ;;  %v506_v41 = vmul.f32 %v502_v6, %v486_v5  ;;  %v431_v15 = vsel %vm427_vm1, 65537, %v1258_v27 }
 0x16a   : > { %v910_v3 = vadd.f32 -40.0, %v504_v0  ;;  %v537_v53 = vmul.f32 1.442695, %v916_v4  ;;  %v436_v19 = vunpack.c.l.b16 %v432_v14  ;;  %v435_v23 = vunpack.c.l.b16 %v431_v15 }
 0x16b   : > { %v533_v7 = vmul.f32 1.442695, %v914_v2  ;;  %v912_v9 = vadd.f32 -40.0, %v506_v41  ;;  %v433_v32 = vsel %vm429_vm2, 65537, %v1258_v27  ;;  %v733_v35 = vlaneseq }
 0x16c   : > { %v513_v8 = vmul.f32 1.442695, %v910_v3  ;;  %vm440_vm3 = vcmp.ne.s32.totalorder %v436_v19, 0  ;;  %vm439_vm4 = vcmp.ne.s32.totalorder %v435_v23, 0  ;;  %v437_v38 = vunpack.c.l.b16 %v433_v32 }
 0x16d   : > { %1057 = vpow2.f32 %v533_v7  ;;  %v517_v50 = vmul.f32 1.442695, %v912_v9  ;;  %v1566_v34 = vsel %vm440_vm3, 1.0, %v1259_v45  ;;  %v1571_v16 = vsel %vm439_vm4, 1.0, %v1259_v45 }
 0x16e   : > { %1059 = vpow2.f32 %v513_v8  ;;  %v434_v40 = vsel %vm430_vm5, 65537, %v1258_v27  ;;  %v1576_v43 = vshrl.u32 %v733_v35, 7  ;;  %vm441_vm6 = vcmp.ne.s32.totalorder %v437_v38, 0 }
 0x16f   : > { %1061 = vpow2.f32 %v537_v53  ;;  %v438_v48 = vunpack.c.l.b16 %v434_v40  ;;  %v1583_v27 = vsel %vm441_vm6, 1.0, %v1259_v45 }
 0x170   : > { %1063 = vpow2.f32 %v517_v50  ;;  %vm739_vm7 = vcmp.eq.s32.totalorder %v1576_v43, 1  ;;  %vm737_vm8 = vcmp.eq.s32.totalorder %v1576_v43, 0  ;;  %vm742_vm6 = vcmp.eq.s32.totalorder %v1576_v43, 2 }
 0x171   : > { %vm442_vm9 = vcmp.ne.s32.totalorder %v438_v48, 0 }
 0x172   : > { %v1050_v10 = vpop.eup %1049  ;;  %v1589_v59 = vsel %vm442_vm9, 1.0, %v1259_v45  ;;  %vm748_vm9 = vcmp.eq.s32.totalorder %v1576_v43, 4 }
 0x173   : > { %v1052_v11 = vpop.eup %1051  ;;  %555 = vadd.xlane.f32.xlu1 %v1050_v10 }
 0x174   : > { %543 = vadd.xlane.f32.xlu0 %v1052_v11 }
 0x175   : > { %v1054_v12 = vpop.eup %1053 }
 0x176   : > { %v1056_v13 = vpop.eup %1055 }
 0x177   : > { %551 = vadd.xlane.f32.xlu1 %v1054_v12 }
 0x178   : > { %539 = vadd.xlane.f32.xlu0 %v1056_v13 }
 0x17a   : > { %v1058_v17 = vpop.eup %1057 }
 0x17b   : > { %v1060_v18 = vpop.eup %1059  ;;  %553 = vadd.xlane.f32.xlu1 %v1058_v17  ;;  %v706_v21 = vadd.f32 %v1058_v17, %v1054_v12 }
 0x17c   : > { %541 = vadd.xlane.f32.xlu0 %v1060_v18  ;;  %v697_v24 = vadd.f32 %v1060_v18, %v1056_v13  ;;  %v1062_v28 = vpop.eup %1061 }
 0x17d   : > { %v707_v25 = vadd.f32 %v1050_v10, %v706_v21  ;;  %v1064_v30 = vpop.eup %1063 }
 0x17e   : > { %v698_v26 = vadd.f32 %v1052_v11, %v697_v24 }
 0x17f   : > { %557 = vadd.xlane.f32.xlu1 %v1062_v28  ;;  %v708_v20 = vadd.f32 %v1062_v28, %v707_v25 }
 0x180   : > { %545 = vadd.xlane.f32.xlu0 %v1064_v30  ;;  %v699_v31 = vadd.f32 %v1064_v30, %v698_v26 }
 0x181   : > { %v709_v29 = vrot.slane %v708_v20, 4 }
 0x182   : > { %v700_v36 = vrot.slane %v699_v31, 4 }
 0x183   : > { %641 = vadd.xlane.f32.xlu1 %v1566_v34  ;;  %v710_v37 = vadd.f32 %v709_v29, %v708_v20 }
 0x184   : > { %639 = vadd.xlane.f32.xlu0 %v1571_v16  ;;  %v701_v39 = vadd.f32 %v700_v36, %v699_v31 }
 0x185   : > { %v711_v42 = vrot.slane %v710_v37, 2 }
 0x186   : > { %v702_v44 = vrot.slane %v701_v39, 2 }
 0x187   : > { %649 = vadd.xlane.f32.xlu1 %v1529_v57  ;;  %v712_v22 = vadd.f32 %v711_v42, %v710_v37 }
 0x188   : > { %647 = vadd.xlane.f32.xlu0 %v1516_v47  ;;  %v703_v51 = vadd.f32 %v702_v44, %v701_v39 }
 0x189   : > { %v713_v52 = vrot.slane %v712_v22, 1 }
 0x18a   : > { %v704_v55 = vrot.slane %v703_v51, 1 }
 0x18b   : > { %651 = vadd.xlane.f32.xlu1 %v1513_v46  ;;  %v714_v33 = vadd.f32 %v713_v52, %v712_v22 }
 0x18c   : > { %643 = vadd.xlane.f32.xlu0 %v1583_v27  ;;  %v705_v49 = vadd.f32 %v704_v55, %v703_v51 }
 0x18d   : > { %v740_v56 = vsel %vm739_vm7, %v714_v33, 0.0  ;;  %vm745_vm7 = vcmp.eq.s32.totalorder %v1576_v43, 3 }
 0x18e   : > { %v738_v58 = vsel %vm737_vm8, %v705_v49, 0.0 }
 0x18f   : > { %653 = vadd.xlane.f32.xlu1 %v1524_v54  ;;  %v1591_v60 = vadd.f32 %v740_v56, %v738_v58 }
 0x190   : > { %645 = vadd.xlane.f32.xlu0 %v1589_v59 }
 0x1fc   : > { %v556_v61 = vpop.xlane.xlu1 %555 }
 0x1fd   : > { %v923_v62 = vadd.f32 -3.3986834e-16, %v556_v61  ;;  %v544_v63 = vpop.xlane.xlu0 %543 }
 0x1fe   : > { %v919_v0 = vadd.f32 -3.3986834e-16, %v544_v63 }
 0x1ff   : > { %v581_v1 = vmax.f32 %v923_v62, 1e-30 }
 0x200   : > { %v565_v2 = vmax.f32 %v919_v0, 1e-30  ;;  %v552_v3 = vpop.xlane.xlu1 %551 }
 0x201   : > { %1065 = vlog2.f32 %v581_v1  ;;  %v921_v4 = vadd.f32 -3.3986834e-16, %v552_v3  ;;  %v540_v5 = vpop.xlane.xlu0 %539 }
 0x202   : > { %1067 = vlog2.f32 %v565_v2  ;;  %v917_v6 = vadd.f32 -3.3986834e-16, %v540_v5 }
 0x203   : > { %v579_v7 = vmax.f32 %v921_v4, 1e-30 }
 0x204   : > { %v563_v8 = vmax.f32 %v917_v6, 1e-30  ;;  %v554_v41 = vpop.xlane.xlu1 %553 }
 0x205   : > { %1069 = vlog2.f32 %v579_v7  ;;  %v922_v53 = vadd.f32 -3.3986834e-16, %v554_v41  ;;  %v542_v9 = vpop.xlane.xlu0 %541 }
 0x206   : > { %1071 = vlog2.f32 %v563_v8  ;;  %v918_v50 = vadd.f32 -3.3986834e-16, %v542_v9 }
 0x207   : > { %v580_v10 = vmax.f32 %v922_v53, 1e-30 }
 0x208   : > { %v564_v11 = vmax.f32 %v918_v50, 1e-30  ;;  %v558_v12 = vpop.xlane.xlu1 %557 }
 0x209   : > { %1073 = vlog2.f32 %v580_v10  ;;  %v924_v13 = vadd.f32 -3.3986834e-16, %v558_v12  ;;  %v546_v14 = vpop.xlane.xlu0 %545 }
 0x20a   : > { %1075 = vlog2.f32 %v564_v11  ;;  %v920_v15 = vadd.f32 -3.3986834e-16, %v546_v14  ;;  %v715_v14 = vadd.f32 %v1566_v34, %v1571_v16 }
 0x20b   : > { %v582_v17 = vmax.f32 %v924_v13, 1e-30 }
 0x20c   : > { %v566_v18 = vmax.f32 %v920_v15, 1e-30  ;;  %v642_v7 = vpop.xlane.xlu1 %641 }
 0x20d   : > { %1077 = vlog2.f32 %v582_v17  ;;  %v640_v8 = vpop.xlane.xlu0 %639  ;;  %vm656_vm10 = vcmp.gt.f32.partialorder %v642_v7, 0.0 }
 0x20e   : > { %v1066_v19 = vpop.eup %1065  ;;  %1079 = vlog2.f32 %v566_v18  ;;  %vm655_vm12 = vcmp.gt.f32.partialorder %v640_v8, 0.0 }
 0x20f   : > { %v1068_v21 = vpop.eup %1067  ;;  %v588_v23 = vmul.f32 0.6931472, %v1066_v19 }
 0x210   : > { %v572_v24 = vmul.f32 0.6931472, %v1068_v21  ;;  %v650_v50 = vpop.xlane.xlu1 %649  ;;  %v716_v21 = vadd.f32 %v1583_v27, %v715_v14 }
 0x211   : > { %v593_v25 = vadd.f32 40.0, %v588_v23  ;;  %v648_v10 = vpop.xlane.xlu0 %647  ;;  %vm660_vm11 = vcmp.gt.f32.partialorder %v650_v50, 80.0  ;;  %v724_v23 = vadd.f32 %v1529_v57, %v1516_v47 }
 0x212   : > { %v1070_v28 = vpop.eup %1069  ;;  %v577_v26 = vadd.f32 40.0, %v572_v24  ;;  %vm659_vm13 = vcmp.gt.f32.partialorder %v648_v10, 80.0  ;;  %vm664_vm14 = vmand %vm656_vm10, %vm660_vm11 }
 0x213   : > { %v1072_v30 = vpop.eup %1071  ;;  %v584_v20 = vmul.f32 0.6931472, %v1070_v28  ;;  %vm663_vm15 = vmand %vm655_vm12, %vm659_vm13  ;;  %v725_v27 = vadd.f32 %v1513_v46, %v724_v23  ;;  %v736_v23 = vand.u32 127, %v733_v35 }
 0x214   : > { %v1594_v31 = vadd.f32 %v593_v25, %v577_v26  ;;  %v568_v32 = vmul.f32 0.6931472, %v1072_v30  ;;  %v652_v15 = vpop.xlane.xlu1 %651  ;;  %v926_v25 = vsel %vm664_vm14, 1.0, %v1259_v45  ;;  %v925_v28 = vsel %vm663_vm15, 1.0, %v1259_v45 }
 0x215   : > { %v591_v29 = vadd.f32 40.0, %v584_v20  ;;  %v644_v17 = vpop.xlane.xlu0 %643  ;;  %vm661_vm0 = vcmp.gt.f32.partialorder %v652_v15, 80.0  ;;  %v717_v30 = vadd.f32 %v1589_v59, %v716_v21  ;;  %v688_v47 = vadd.f32 %v926_v25, %v925_v28 }
 0x216   : > { %v605_v36 = vand.u32 2147483647, %v1594_v31  ;;  %v575_v37 = vadd.f32 40.0, %v568_v32  ;;  %v1074_v38 = vpop.eup %1073  ;;  %vm657_vm1 = vcmp.gt.f32.partialorder %v644_v17, 0.0  ;;  %vm749_vm8 = vcmp.eq.s32.totalorder %v736_v23, 0 }
 0x217   : > { %v1076_v39 = vpop.eup %1075  ;;  %v586_v44 = vmul.f32 0.6931472, %v1074_v38  ;;  %vm665_vm2 = vmand %vm657_vm1, %vm661_vm0  ;;  %v718_v32 = vrot.slane %v717_v30, 4  ;;  %vm753_vm10 = vcmp.eq.s32.totalorder %v736_v23, 1 }
 0x218   : > { %v609_v40 = vsub.f32 0.0, %v605_v36  ;;  %v1597_v42 = vadd.f32 %v591_v29, %v575_v37  ;;  %v570_v22 = vmul.f32 0.6931472, %v1076_v39  ;;  %v654_v16 = vpop.xlane.xlu1 %653  ;;  %v927_v57 = vsel %vm665_vm2, 1.0, %v1259_v45  ;;  %vm750_vm11 = vmand %vm748_vm9, %vm749_vm8 }
 0x219   : > { %v592_v52 = vadd.f32 40.0, %v586_v44  ;;  %v646_v24 = vpop.xlane.xlu0 %645  ;;  %vm662_vm3 = vcmp.gt.f32.partialorder %v654_v16, 80.0  ;;  %v726_v36 = vadd.f32 %v1524_v54, %v725_v27  ;;  %v689_v38 = vadd.f32 %v927_v57, %v688_v47  ;;  %vm754_vm12 = vmand %vm748_vm9, %vm753_vm10 }
 0x21a   : > { %v615_v48 = vmul.f32 1.442695, %v609_v40  ;;  %v603_v51 = vand.u32 2147483647, %v1597_v42  ;;  %v1078_v55 = vpop.eup %1077  ;;  %v576_v33 = vadd.f32 40.0, %v570_v22  ;;  %vm658_vm4 = vcmp.gt.f32.partialorder %v646_v24, 0.0 }
 0x21b   : > { %v1080_v49 = vpop.eup %1079  ;;  %v590_v58 = vmul.f32 0.6931472, %v1078_v55  ;;  %vm666_vm5 = vmand %vm658_vm4, %vm662_vm3  ;;  %v599_v39 = vmax.f32 %v1597_v42, 0.0  ;;  %v719_v46 = vadd.f32 %v718_v32, %v717_v30  ;;  %v727_v44 = vrot.slane %v726_v36, 4 }
 0x21c   : > { %1081 = vpow2.f32 %v615_v48  ;;  %v607_v56 = vsub.f32 0.0, %v603_v51  ;;  %v1600_v61 = vadd.f32 %v592_v52, %v576_v33  ;;  %v574_v62 = vmul.f32 0.6931472, %v1080_v49 }
 0x21d   : > { %v594_v0 = vadd.f32 40.0, %v590_v58  ;;  %v928_v40 = vsel %vm666_vm5, 1.0, %v1259_v45  ;;  %v601_v48 = vmax.f32 %v1594_v31, 0.0  ;;  %v728_v54 = vadd.f32 %v727_v44, %v726_v36 }
 0x21e   : > { %v611_v63 = vmul.f32 1.442695, %v607_v56  ;;  %v604_v1 = vand.u32 2147483647, %v1600_v61  ;;  %v578_v2 = vadd.f32 40.0, %v574_v62  ;;  %v690_v52 = vadd.f32 %v928_v40, %v689_v38 }
 0x21f   : > { %v600_v55 = vmax.f32 %v1600_v61, 0.0  ;;  %v720_v56 = vrot.slane %v719_v46, 2 }
 0x220   : > { %1083 = vpow2.f32 %v611_v63  ;;  %v608_v3 = vsub.f32 0.0, %v604_v1  ;;  %v1603_v4 = vadd.f32 %v594_v0, %v578_v2  ;;  %v691_v0 = vrot.slane %v690_v52, 4 }
 0x222   : > { %v613_v5 = vmul.f32 1.442695, %v608_v3  ;;  %v606_v6 = vand.u32 2147483647, %v1603_v4  ;;  %v602_v42 = vmax.f32 %v1603_v4, 0.0  ;;  %v721_v3 = vadd.f32 %v720_v56, %v719_v46 }
 0x224   : > { %1085 = vpow2.f32 %v613_v5  ;;  %v610_v41 = vsub.f32 0.0, %v606_v6  ;;  %v729_v5 = vrot.slane %v728_v54, 2 }
 0x226   : > { %v617_v53 = vmul.f32 1.442695, %v610_v41  ;;  %v730_v50 = vadd.f32 %v729_v5, %v728_v54 }
 0x228   : > { %1087 = vpow2.f32 %v617_v53  ;;  %v692_v53 = vadd.f32 %v691_v0, %v690_v52  ;;  %v731_v14 = vrot.slane %v730_v50, 1 }
 0x229   : > { %v1082_v9 = vpop.eup %1081 }
 0x22a   : > { %v621_v11 = vadd.f32 1.0, %v1082_v9  ;;  %v722_v9 = vrot.slane %v721_v3, 1  ;;  %v693_v4 = vrot.slane %v692_v53, 2 }
 0x22c   : > { %1089 = vlog2.f32 %v621_v11 }
 0x22d   : > { %v1084_v12 = vpop.eup %1083 }
 0x22e   : > { %v619_v13 = vadd.f32 1.0, %v1084_v12 }
 0x230   : > { %1091 = vlog2.f32 %v619_v13  ;;  %v723_v13 = vadd.f32 %v722_v9, %v721_v3 }
 0x231   : > { %v1086_v18 = vpop.eup %1085 }
 0x232   : > { %v620_v19 = vadd.f32 1.0, %v1086_v18  ;;  %v694_v18 = vadd.f32 %v693_v4, %v692_v53  ;;  %v743_v21 = vsel %vm742_vm6, %v723_v13, 0.0 }
 0x234   : > { %1093 = vlog2.f32 %v620_v19  ;;  %v732_v19 = vadd.f32 %v731_v14, %v730_v50  ;;  %v695_v24 = vrot.slane %v694_v18, 1 }
 0x235   : > { %v1088_v34 = vpop.eup %1087 }
 0x236   : > { %v622_v26 = vadd.f32 1.0, %v1088_v34  ;;  %v696_v27 = vadd.f32 %v695_v24, %v694_v18 }
 0x238   : > { %1095 = vlog2.f32 %v622_v26 }
 0x239   : > { %v1090_v20 = vpop.eup %1089 }
 0x23a   : > { %v628_v59 = vmul.f32 0.6931472, %v1090_v20  ;;  %v755_v20 = vsel %vm754_vm12, %v696_v27, 0.0 }
 0x23c   : > { %v633_v49 = vadd.f32 %v628_v59, %v601_v48 }
 0x23d   : > { %v1092_v29 = vpop.eup %1091 }
 0x23e   : > { %v624_v37 = vmul.f32 0.6931472, %v1092_v29  ;;  %v637_v1 = vmul.f32 0.041666668, %v633_v49 }
 0x240   : > { %v631_v22 = vadd.f32 %v624_v37, %v599_v39  ;;  %v677_v61 = vmul.f32 %v927_v57, %v637_v1 }
 0x241   : > { %v1094_v51 = vpop.eup %1093 }
 0x242   : > { %v626_v33 = vmul.f32 0.6931472, %v1094_v51  ;;  %v635_v62 = vmul.f32 0.041666668, %v631_v22 }
 0x244   : > { %v632_v58 = vadd.f32 %v626_v33, %v600_v55  ;;  %v675_v6 = vmul.f32 %v925_v28, %v635_v62  ;;  %v746_v28 = vsel %vm745_vm7, %v732_v19, 0.0 }
 0x245   : > { %v1096_v63 = vpop.eup %1095 }
 0x246   : > { %v636_v45 = vmul.f32 0.041666668, %v632_v58  ;;  %v630_v2 = vmul.f32 0.6931472, %v1096_v63 }
 0x248   : > { %v676_v31 = vmul.f32 %v926_v25, %v636_v45  ;;  %v634_v7 = vadd.f32 %v630_v2, %v602_v42  ;;  %v744_v25 = vadd.f32 %v743_v21, %v1591_v60 }
 0x24a   : > { %v679_v8 = vadd.f32 %v676_v31, %v675_v6  ;;  %v638_v41 = vmul.f32 0.041666668, %v634_v7  ;;  %v747_v35 = vadd.f32 %v746_v28, %v744_v25 }
 0x24c   : > { %v680_v10 = vadd.f32 %v679_v8, %v677_v61  ;;  %v678_v11 = vmul.f32 %v928_v40, %v638_v41 }
 0x24e   : > { %v681_v12 = vadd.f32 %v680_v10, %v678_v11 }
 0x250   : > { %v682_v15 = vrot.slane %v681_v12, 4 }
 0x252   : > { %v683_v17 = vadd.f32 %v682_v15, %v681_v12 }
 0x254   : > { %v684_v34 = vrot.slane %v683_v17, 2 }
 0x256   : > { %v685_v16 = vadd.f32 %v684_v34, %v683_v17 }
 0x258   : > { %v686_v26 = vrot.slane %v685_v16, 1 }
 0x25a   : > { %v687_v30 = vadd.f32 %v686_v26, %v685_v16 }
 0x25c   : > { %v751_v47 = vsel %vm750_vm11, %v687_v30, 0.0 }
 0x25d   : > { %v752_v57 = vadd.f32 %v751_v47, %v747_v35 }
 0x25f   : > { %v756_v32 = vadd.f32 %v755_v20, %v752_v57 }
 0x261   : > { %757 = vst [vmem:[%s240_s8] sm:$0xff] %v756_v32 }
 0x262   : > { %1192 = shalt.err (!%p1189_p2)
}
 0x263   : > { %s1193_s30 = scalar_lea.hbm %s770_s6, 128  ;;  %s1197_s17 = scalar_lea.hbm %s1666_s3, 256 }
 0x264   : > { %p1194_p7 = scmp.ne.s32.totalorder %s770_s6, %s1193_s30  ;;  %p1198_p6 = scmp.lt.s32.totalorder %s770_s6, %s1666_s3 }
 0x265   : > { %p1199_p13 = scmp.lt.s32.totalorder %s1197_s17, %s1193_s30 }
 0x266   : > { %p1195_p11 = pnand %p1194_p7, %p1680_p10 }
 0x267   : > { %p1200_p0 = por %p1199_p13, %p1198_p6 }
 0x268   : > { %p1196_p4 = pneg %p1195_p11 }
 0x26a   : > { %p1201_p8 = pnand %p1200_p0, %p1196_p4 }
 0x26c   : > { %1204 = shalt.err (!%p1201_p8)
}
 0x26d   : > { %973 = dma.vmem_to_hbm [thread:$0]  (%p1680_p10), %s773_s10, 128, %s770_s6, %s759_s9  }
 0x26e PF: > { %s784_s20 = sand.u32 1, %s1239_s12   ;;  %p1681_p9 = scmp.ne.s32.totalorder %s1673_s26, 0 }
 0x26f   : > { %p1682_p3 = scmp.ge.s32.totalorder %s1251_s15, 2  ;;  %s785_s21 = scalar_lea.sflag [#allocation4], %s784_s20 }
 0x271   : > { %p987_p1 = pnand %p1682_p3, %p1681_p9 }
 0x273   : > { %p988_p5 = pneg %p987_p1 }
 0x275   : > { %1234 = dma.done.wait (%p988_p5), %s785_s21, 128  }
 0x276   : > { %1236 = vsyncadd (%p988_p5), %s785_s21, 4294967168  ;;  %p17_p12 = scmp.ge.s32.totalorder %s1302_s16, 4   ;;  %s1683_s12 = smov %s1243_s13 }
 0x277   : > { %s1684_s13 = smov %s1247_s14  ;;  %s1685_s14 = smov %s1311_s19 }
 0x278   : > { %s1686_s15 = smov %s1302_s16  ;;  %19 = sbr.rel (!%p17_p12) target bundleno = 6 (0x6), region = 92 }
 0x27d   :  { %790 = vsyncpa [#allocation3], 1 }
 0x27e   :  { %792 = vsyncpa [#allocation3 + $0x1], 1 }
 0x27f   :  { %793 = vsyncpa [#allocation6], 1 }
 0x280   :  { %794 = vsyncpa [#allocation4], 1 }
 0x281   :  { %796 = vsyncpa [#allocation4 + $0x1], 1 }

</bundles_post_ra>
